<compile_context>
chip_gen: v5e
topology: v5e:2x2
jax: 0.10.0
libtpu: 0.0.40
codegen_flags: <defaults>
</compile_context>

<pallas_src>
import functools

import jax
import jax.numpy as jnp
from jax.experimental import pallas as pl
from jax.experimental.pallas import tpu as pltpu

LANES = 128


def _ohem_kernel(logits_ref, target_ref, negloss_ref, partials_ref,
                 *, ignore_index):
    # logits_ref:  (C, tile_r, 128) f32   (class-major, pixels on lanes)
    # target_ref:  (tile_r, 128)    i32
    # negloss_ref: (tile_r, 128)    f32   per-pixel negative CE (-inf elsewhere)
    # partials_ref:(1, 3, 128)      f32   lane-wise partial sums:
    #                                     [0]=sum(pos CE), [1]=#pos, [2]=#neg
    x = logits_ref[...].astype(jnp.float32)          # (C, tr, 128)
    t = target_ref[...]                               # (tr, 128)

    # First softmax over the class (leading) axis — elementwise across C vregs.
    m1 = jnp.max(x, axis=0)                            # (tr, 128)
    e1 = jnp.exp(x - m1[None])                         # (C, tr, 128)
    p = e1 * pl.reciprocal(jnp.sum(e1, axis=0), approx=True)[None]

    # F.cross_entropy applies its own log-softmax on `p` (TPSNet quirk):
    #   ce = logsumexp(p) - p[target].  p is in [0, 1], so no max-subtract
    # is needed for stability.
    lse = jnp.log(jnp.sum(jnp.exp(p), axis=0))         # (tr, 128)

    C = x.shape[0]
    if C == 2:
        # Cheap per-class select instead of one-hot gather.
        p_t = jnp.where(t == 1, p[1], p[0])
    else:
        cls = jax.lax.broadcasted_iota(jnp.int32, x.shape, 0)   # (C, tr, 128)
        p_t = jnp.sum(jnp.where(cls == t[None], p, 0.0), axis=0)
    ce = lse - p_t                                     # (tr, 128), always > 0

    valid = t != ignore_index
    pos = jnp.logical_and(t != 0, valid)               # (target * mask).bool()
    neg = jnp.logical_and(t != 1, valid)               # ((1 - target) * mask).bool()
    posf = pos.astype(jnp.float32)
    negf = neg.astype(jnp.float32)

    # Lane-dense, unmasked full-block store.
    negloss_ref[...] = jnp.where(neg, ce, jnp.float32(-jnp.inf))

    # Per-tile lane partial sums (reduce over sublanes only); final reduction
    # to scalars happens in the XLA glue.  Single merged output => one small
    # block pipeline instead of three.
    lp = jnp.sum(ce * posf, axis=0, keepdims=True)     # (1, 128)
    np_ = jnp.sum(posf, axis=0, keepdims=True)         # (1, 128)
    nn = jnp.sum(negf, axis=0, keepdims=True)          # (1, 128)
    partials_ref[...] = jnp.concatenate([lp, np_, nn], axis=0)[None]  # (1,3,128)


def ohem_ce_loss(predict, target, *, num_classes=2, ohem_ratio=3.0,
                 ignore_index=255, min_kept=100000, tile_r=512):
    # NOTE: ohem_ratio is accepted but unused — this matches the TPSNet
    # reference, which never reads self.ohem_ratio in forward().
    del ohem_ratio
    N, C, H, W = predict.shape
    assert C == num_classes
    P = N * H * W

    # Class-major relayout: only swaps the two leading axes (cheap block copy),
    # no NCHW->NHWC element-level transpose.  Pixel order (n, h, w) matches
    # target.view(-1) in the reference.
    logits_cm = jnp.transpose(predict, (1, 0, 2, 3)).reshape(C, P).astype(jnp.float32)
    # TODO(synk): optionally cast logits to bf16 here (upcast happens in-kernel)
    # to halve the dominant HBM read; kept f32 to match PyTorch numerics.
    tgt_flat = target.reshape(P).astype(jnp.int32)

    # Pad pixel count so the grid tiles evenly; padded pixels get
    # target == ignore_index and therefore contribute nothing.
    R = pl.cdiv(P, LANES)
    tile_r = min(tile_r, max(R, 1))
    num_tiles = pl.cdiv(R, tile_r)
    R_pad = num_tiles * tile_r
    P_pad = R_pad * LANES
    if P_pad != P:
        logits_cm = jnp.pad(logits_cm, ((0, 0), (0, P_pad - P)))
        tgt_flat = jnp.pad(tgt_flat, (0, P_pad - P), constant_values=ignore_index)

    logits_cm = logits_cm.reshape(C, R_pad, LANES)
    tgt2 = tgt_flat.reshape(R_pad, LANES)

    kern = functools.partial(_ohem_kernel, ignore_index=ignore_index)
    neg_loss, partials = pl.pallas_call(
        kern,
        grid=(num_tiles,),
        in_specs=[
            pl.BlockSpec((C, tile_r, LANES), lambda i: (0, i, 0)),
            pl.BlockSpec((tile_r, LANES), lambda i: (i, 0)),
        ],
        out_specs=[
            pl.BlockSpec((tile_r, LANES), lambda i: (i, 0)),
            pl.BlockSpec((1, 3, LANES), lambda i: (i, 0, 0)),
        ],
        out_shape=[
            jax.ShapeDtypeStruct((R_pad, LANES), jnp.float32),
            jax.ShapeDtypeStruct((num_tiles, 3, LANES), jnp.float32),
        ],
        compiler_params=pltpu.CompilerParams(
            dimension_semantics=("parallel",)),   # megacore-friendly on v7x
    )(logits_cm, tgt2)

    loss_pos = jnp.sum(partials[:, 0, :])
    n_pos = jnp.sum(partials[:, 1, :])
    n_neg_cnt = jnp.sum(partials[:, 2, :])

    # OHEM hard-negative selection (reference: n_neg = min(#neg, min_kept) if
    # n_pos > 0 else 100; keep top-n_neg negative losses).
    n_neg = jnp.where(n_pos > 0.0,
                      jnp.minimum(n_neg_cnt, jnp.float32(min_kept)),
                      jnp.float32(100.0))
    k_keep = jnp.minimum(n_neg_cnt, n_neg)

    # TODO(synk): dynamic-k torch.topk has no Pallas primitive; bounded
    # lax.top_k (static upper bound) + dynamic rank mask in XLA glue instead of
    # a full O(P log P) sort.  -inf sentinels are never selected because
    # k_keep <= n_neg_cnt.
    k_static = int(min(max(min_kept, 100), P_pad))
    neg_vals, _ = jax.lax.top_k(neg_loss.reshape(-1), k_static)   # descending
    ranks = jnp.arange(k_static, dtype=jnp.float32)
    loss_neg_sum = jnp.sum(jnp.where(ranks < k_keep, neg_vals, 0.0))

    return (loss_pos + loss_neg_sum) / (n_pos + n_neg)


if __name__ == "__main__":
    key = jax.random.PRNGKey(0)
    k1, k2, k3 = jax.random.split(key, 3)

    N, C, H, W = 2, 2, 16, 16                       # num_classes = 2
    predict = jax.random.normal(k1, (N, C, H, W), dtype=jnp.float32)
    target = jax.random.randint(k2, (N, H, W), 0, C).astype(jnp.int32)
    ignore_mask = jax.random.bernoulli(k3, 0.1, (N, H, W))
    target = jnp.where(ignore_mask, 255, target).astype(jnp.int32)

    loss = ohem_ce_loss(predict, target, num_classes=C,
                        ignore_index=255, min_kept=100000)
    jax.block_until_ready(loss)
    print("KERNEL_OK")
</pallas_src>

<mosaic_0001>
module attributes {stable_mosaic.version = 11 : i64} {
  func.func @_ohem_kernel(%arg0: i32, %arg1: memref<2x4x128xf32, #tpu.memory_space<vmem>>, %arg2: memref<4x128xi32, #tpu.memory_space<vmem>>, %arg3: memref<4x128xf32, #tpu.memory_space<vmem>>, %arg4: memref<1x3x128xf32, #tpu.memory_space<vmem>>) attributes {dimension_semantics = [#tpu.dimension_semantics<parallel>], iteration_bounds = array<i64: 1>, scalar_prefetch = 0 : i64, scratch_operands = 0 : i64, tpu.core_type = #tpu.core_type<tc>, window_params = [{transform_indices = @transform_0, window_bounds = array<i64: 2, 4, 128>}, {transform_indices = @transform_1, window_bounds = array<i64: 4, 128>}, {transform_indices = @transform_2, window_bounds = array<i64: 4, 128>}, {transform_indices = @transform_3, window_bounds = array<i64: 1, 3, 128>}]} {
    %c0 = arith.constant 0 : index
    %c0_0 = arith.constant 0 : index
    %c0_1 = arith.constant 0 : index
    %0 = vector.load %arg1[%c0, %c0_0, %c0_1] : memref<2x4x128xf32, #tpu.memory_space<vmem>>, vector<2x4x128xf32>
    %c0_2 = arith.constant 0 : index
    %c0_3 = arith.constant 0 : index
    %1 = vector.load %arg2[%c0_2, %c0_3] : memref<4x128xi32, #tpu.memory_space<vmem>>, vector<4x128xi32>
    %cst = arith.constant dense<0xFF800000> : vector<4x128xf32>
    %2 = vector.multi_reduction <maximumf>, %0, %cst [0] : vector<2x4x128xf32> to vector<4x128xf32>
    %3 = vector.shape_cast %2 : vector<4x128xf32> to vector<1x4x128xf32>
    %4 = vector.broadcast %3 : vector<1x4x128xf32> to vector<2x4x128xf32>
    %5 = arith.subf %0, %4 : vector<2x4x128xf32>
    %6 = math.exp %5 : vector<2x4x128xf32>
    %cst_4 = arith.constant dense<0.000000e+00> : vector<4x128xf32>
    %7 = vector.multi_reduction <add>, %6, %cst_4 [0] : vector<2x4x128xf32> to vector<4x128xf32>
    %8 = tpu.reciprocal %7 {approx = true} : vector<4x128xf32> -> vector<4x128xf32>
    %9 = vector.shape_cast %8 : vector<4x128xf32> to vector<1x4x128xf32>
    %10 = vector.broadcast %9 : vector<1x4x128xf32> to vector<2x4x128xf32>
    %11 = arith.mulf %6, %10 : vector<2x4x128xf32>
    %12 = math.exp %11 : vector<2x4x128xf32>
    %cst_5 = arith.constant dense<0.000000e+00> : vector<4x128xf32>
    %13 = vector.multi_reduction <add>, %12, %cst_5 [0] : vector<2x4x128xf32> to vector<4x128xf32>
    %14 = math.log %13 : vector<4x128xf32>
    %c1_i32 = arith.constant 1 : i32
    %15 = vector.broadcast %c1_i32 : i32 to vector<4x128xi32>
    %16 = arith.cmpi eq, %1, %15 : vector<4x128xi32>
    %17 = vector.extract_strided_slice %11 {offsets = [1, 0, 0], sizes = [1, 4, 128], strides = [1, 1, 1]} : vector<2x4x128xf32> to vector<1x4x128xf32>
    %18 = vector.shape_cast %17 : vector<1x4x128xf32> to vector<4x128xf32>
    %19 = vector.extract_strided_slice %11 {offsets = [0, 0, 0], sizes = [1, 4, 128], strides = [1, 1, 1]} : vector<2x4x128xf32> to vector<1x4x128xf32>
    %20 = vector.shape_cast %19 : vector<1x4x128xf32> to vector<4x128xf32>
    %21 = arith.select %16, %18, %20 : vector<4x128xi1>, vector<4x128xf32>
    %22 = arith.subf %14, %21 : vector<4x128xf32>
    %c255_i32 = arith.constant 255 : i32
    %23 = vector.broadcast %c255_i32 : i32 to vector<4x128xi32>
    %24 = arith.cmpi ne, %1, %23 : vector<4x128xi32>
    %c0_i32 = arith.constant 0 : i32
    %25 = vector.broadcast %c0_i32 : i32 to vector<4x128xi32>
    %26 = arith.cmpi ne, %1, %25 : vector<4x128xi32>
    %27 = arith.andi %26, %24 : vector<4x128xi1>
    %c1_i32_6 = arith.constant 1 : i32
    %28 = vector.broadcast %c1_i32_6 : i32 to vector<4x128xi32>
    %29 = arith.cmpi ne, %1, %28 : vector<4x128xi32>
    %30 = arith.andi %29, %24 : vector<4x128xi1>
    %31 = arith.extui %27 : vector<4x128xi1> to vector<4x128xi32>
    %32 = arith.sitofp %31 : vector<4x128xi32> to vector<4x128xf32>
    %33 = arith.extui %30 : vector<4x128xi1> to vector<4x128xi32>
    %34 = arith.sitofp %33 : vector<4x128xi32> to vector<4x128xf32>
    %cst_7 = arith.constant 0xFF800000 : f32
    %35 = vector.broadcast %cst_7 : f32 to vector<4x128xf32>
    %36 = arith.select %30, %22, %35 : vector<4x128xi1>, vector<4x128xf32>
    %c0_8 = arith.constant 0 : index
    %c0_9 = arith.constant 0 : index
    %37 = vector.load %arg3[%c0_8, %c0_9] : memref<4x128xf32, #tpu.memory_space<vmem>>, vector<4x128xf32>
    tpu.vector_store %arg3[%c0_8, %c0_9], %36 {strides = array<i32>} : memref<4x128xf32, #tpu.memory_space<vmem>>, vector<4x128xf32>,
    %38 = arith.mulf %22, %32 : vector<4x128xf32>
    %cst_10 = arith.constant dense<0.000000e+00> : vector<128xf32>
    %39 = vector.multi_reduction <add>, %38, %cst_10 [0] : vector<4x128xf32> to vector<128xf32>
    %40 = vector.shape_cast %39 : vector<128xf32> to vector<1x128xf32>
    %cst_11 = arith.constant dense<0.000000e+00> : vector<128xf32>
    %41 = vector.multi_reduction <add>, %32, %cst_11 [0] : vector<4x128xf32> to vector<128xf32>
    %42 = vector.shape_cast %41 : vector<128xf32> to vector<1x128xf32>
    %cst_12 = arith.constant dense<0.000000e+00> : vector<128xf32>
    %43 = vector.multi_reduction <add>, %34, %cst_12 [0] : vector<4x128xf32> to vector<128xf32>
    %44 = vector.shape_cast %43 : vector<128xf32> to vector<1x128xf32>
    %45 = tpu.concatenate %40, %42, %44 in 0 : vector<1x128xf32>, vector<1x128xf32>, vector<1x128xf32> -> vector<3x128xf32>
    %46 = vector.shape_cast %45 : vector<3x128xf32> to vector<1x3x128xf32>
    %c0_13 = arith.constant 0 : index
    %c0_14 = arith.constant 0 : index
    %c0_15 = arith.constant 0 : index
    %47 = vector.load %arg4[%c0_13, %c0_14, %c0_15] : memref<1x3x128xf32, #tpu.memory_space<vmem>>, vector<1x3x128xf32>
    tpu.vector_store %arg4[%c0_13, %c0_14, %c0_15], %46 {strides = array<i32>} : memref<1x3x128xf32, #tpu.memory_space<vmem>>, vector<1x3x128xf32>,
    return
  }
  func.func @transform_0(%arg0: i32) -> (i32, i32, i32) {
    %c0_i32 = arith.constant 0 : i32
    %c0_i32_0 = arith.constant 0 : i32
    %c0_i32_1 = arith.constant 0 : i32
    return %c0_i32, %arg0, %c0_i32_0 : i32, i32, i32
  }
  func.func @transform_1(%arg0: i32) -> (i32, i32) {
    %c0_i32 = arith.constant 0 : i32
    %c0_i32_0 = arith.constant 0 : i32
    return %arg0, %c0_i32 : i32, i32
  }
  func.func @transform_2(%arg0: i32) -> (i32, i32) {
    %c0_i32 = arith.constant 0 : i32
    %c0_i32_0 = arith.constant 0 : i32
    return %arg0, %c0_i32 : i32, i32
  }
  func.func @transform_3(%arg0: i32) -> (i32, i32, i32) {
    %c0_i32 = arith.constant 0 : i32
    %c0_i32_0 = arith.constant 0 : i32
    %c0_i32_1 = arith.constant 0 : i32
    return %arg0, %c0_i32, %c0_i32_0 : i32, i32, i32
  }
}

</mosaic_0001>

<bundles_post_ra>
// kernel: tpu_custom_call.1
= control target key start
LH: loop header
LB: loop body
LE: loop exit
PB: predicated region body
PF: predicated region fallthrough
CT: control target
= control target key end

     0   :  { %9 = vsyncpa [#allocation3], 0  ;;  %s288_s0 = inlined_call_operand.hbm [shape: f32[2,4,128], index: 0, kind: input, shape index: {}]   ;;  %s289_s1 = inlined_call_operand.hbm [shape: s32[4,128], index: 1, kind: input, shape index: {}]   ;;  %s290_s2 = inlined_call_operand.hbm [shape: f32[4,128], index: 2, kind: output, shape index: {0}]   ;;  %s291_s3 = inlined_call_operand.vmem [shape: f32[1,3,128], index: 3, kind: output, shape index: {1}]  }
   0x1   :  { %10 = vsyncpa [#allocation6], 0 }
   0x2   :  { %11 = vsyncpa [#allocation4], 0  ;;  %s16_s14 = sshll.u32 %s288_s0, 4  ;;  %s233_s15 = smov [#allocation2]   ;;  %s17_s14 = int_to_ptr.hbm [resolvable:$true] %s16_s14 }
   0x3   :  { %s18_s16 = sshll.u32 %s233_s15, 4  ;;  %s30_s19 = sshll.u32 %s289_s1, 4  ;;  %s19_s16 = int_to_ptr.vmem [resolvable:$true] %s18_s16  ;;  %s31_s19 = int_to_ptr.hbm [resolvable:$true] %s30_s19 }
   0x4   :  { %s234_s20 = smov 64   ;;  %s235_s21 = smov 4  }
   0x5   :  { %24 = dma.hbm_to_vmem [thread:$0]  %s17_s14, 128, %s19_s16, [#allocation3], %s234_s20, %s234_s20, %s235_s21  }
   0x6   :  { %s236_s22 = smov [#allocation5]  }
   0x7   :  { %s32_s23 = sshll.u32 %s236_s22, 4  ;;  %s33_s23 = int_to_ptr.vmem [resolvable:$true] %s32_s23 }
   0x8   :  { %35 = dma.hbm_to_vmem [thread:$0]  %s31_s19, 64, %s33_s23, [#allocation6]  }
   0x9   :  { %227 = dma.done.wait [#allocation3], 128  }
   0xa   :  { %228 = vsyncadd [#allocation3], 4294967168 }
   0xb   :  { %229 = dma.done.wait [#allocation6], 64  }
   0xc   :  { %230 = vsyncadd [#allocation6], 4294967232  ;;  %vm47_vm0 = vcmask 1043456   ;;  %v44_v0 = vld [vmem:[#allocation2] sm:$0xf]  ;;  %v237_v25 = vmov 0.0  }
   0xd   :  { %v45_v1 = vld [vmem:[#allocation2 + $0x4] sm:$0xf]  ;;  %v48_v2 = vsel %vm47_vm0, %v44_v0, -inf  ;;  %v46_v19 = vld [vmem:[#allocation5] sm:$0xf]  ;;  %s238_s0 = smov [#allocation7]  }
   0xe   :  { %v49_v3 = vsel %vm47_vm0, %v45_v1, -inf  ;;  %vm78_vm1 = vcmp.ne.s32.totalorder %v46_v19, 1  ;;  %vm75_vm2 = vcmp.ne.s32.totalorder %v46_v19, 255  ;;  %vm76_vm3 = vcmp.ne.s32.totalorder %v46_v19, 0  ;;  %s118_s1 = sshll.u32 %s238_s0, 4  ;;  %s120_s26 = sshll.u32 %s290_s2, 4  ;;  %s119_s1 = int_to_ptr.vmem [resolvable:$true] %s118_s1  ;;  %s121_s26 = int_to_ptr.hbm [resolvable:$true] %s120_s26 }
   0xf   :  { %v50_v4 = vmax.f32 %v48_v2, %v49_v3  ;;  %vm269_vm4 = vmand %vm78_vm1, %vm75_vm2  ;;  %vm72_vm6 = vcmp.eq.s32.totalorder %v46_v19, 1  ;;  %vm108_vm7 = vcmask 1040384   ;;  %vm110_vm8 = vcmask 1041408  }
  0x10   :  { %vm77_vm5 = vmand %vm76_vm3, %vm75_vm2  ;;  %v136_v26 = vsel %vm269_vm4, 1.0, %v237_v25 }
  0x11   :  { %v51_v5 = vsub.f32 %v44_v0, %v50_v4  ;;  %v52_v6 = vsub.f32 %v45_v1, %v50_v4  ;;  %v135_v28 = vsel %vm77_vm5, 1.0, %v237_v25  ;;  %v101_v30 = vsel %vm47_vm0, %v136_v26, 0.0 }
  0x12   :  { %v94_v29 = vsel %vm47_vm0, %v135_v28, 0.0  ;;  %v102_v32 = vrot.slane %v101_v30, 4 }
  0x13   :  { %v53_v7 = vmul.f32 1.442695, %v51_v5  ;;  %v55_v8 = vmul.f32 1.442695, %v52_v6  ;;  %v95_v31 = vrot.slane %v94_v29, 4 }
  0x14   :  { %v103_v37 = vadd.f32 %v102_v32, %v101_v30 }
  0x15   :  { %143 = vpow2.f32 %v53_v7  ;;  %v96_v35 = vadd.f32 %v95_v31, %v94_v29 }
  0x16   :  { %145 = vpow2.f32 %v55_v8  ;;  %v104_v42 = vrot.slane %v103_v37, 2 }
  0x17   :  { %v97_v39 = vrot.slane %v96_v35, 2 }
  0x18   :  { %v105_v46 = vadd.f32 %v104_v42, %v103_v37 }
  0x19   :  { %v98_v45 = vadd.f32 %v97_v39, %v96_v35 }
  0x1a   :  { %v106_v50 = vrot.slane %v105_v46, 1 }
  0x1b   :  { %v144_v9 = vpop.eup %143  ;;  %v99_v49 = vrot.slane %v98_v45, 1 }
  0x1c   :  { %v146_v10 = vpop.eup %145  ;;  %v57_v11 = vsel %vm47_vm0, %v144_v9, 0.0  ;;  %v107_v54 = vadd.f32 %v106_v50, %v105_v46 }
  0x1d   :  { %v58_v12 = vsel %vm47_vm0, %v146_v10, 0.0  ;;  %v100_v53 = vadd.f32 %v99_v49, %v98_v45 }
  0x1e   :  { %v59_v13 = vadd.f32 %v58_v12, %v57_v11 }
  0x20   :  { %147 = vrcp.f32 %v59_v13 }
  0x26   :  { %v148_v14 = vpop.eup %147 }
  0x27   :  { %v61_v15 = vmul.f32 %v148_v14, %v144_v9  ;;  %v62_v16 = vmul.f32 %v148_v14, %v146_v10 }
  0x29   :  { %v63_v17 = vmul.f32 1.442695, %v61_v15  ;;  %v65_v18 = vmul.f32 1.442695, %v62_v16  ;;  %v73_v34 = vsel %vm72_vm6, %v62_v16, %v61_v15 }
  0x2b   :  { %149 = vpow2.f32 %v63_v17 }
  0x2c   :  { %151 = vpow2.f32 %v65_v18 }
  0x31   :  { %v150_v21 = vpop.eup %149 }
  0x32   :  { %v152_v22 = vpop.eup %151  ;;  %v67_v23 = vsel %vm47_vm0, %v150_v21, 0.0 }
  0x33   :  { %v68_v24 = vsel %vm47_vm0, %v152_v22, 0.0 }
  0x34   :  { %v69_v27 = vadd.f32 %v68_v24, %v67_v23 }
  0x36   :  { %153 = vlog2.f32 %v69_v27 }
  0x3c   :  { %v154_v33 = vpop.eup %153 }
  0x3d   :  { %v71_v36 = vmul.f32 0.6931472, %v154_v33 }
  0x3f   :  { %v74_v38 = vsub.f32 %v71_v36, %v73_v34 }
  0x41   :  { %v84_v40 = vsel %vm269_vm4, %v74_v38, -inf  ;;  %v86_v41 = vmul.f32 %v135_v28, %v74_v38 }
  0x42   :  { %85 = vst [vmem:[#allocation7] sm:$0xf] %v84_v40 }
  0x43   :  { %v87_v43 = vsel %vm47_vm0, %v86_v41, 0.0  ;;  %123 = dma.vmem_to_hbm [thread:$0]  %s119_s1, 64, %s121_s26, [#allocation4]  }
  0x44   :  { %v88_v44 = vrot.slane %v87_v43, 4 }
  0x46   :  { %v89_v47 = vadd.f32 %v88_v44, %v87_v43 }
  0x48   :  { %v90_v48 = vrot.slane %v89_v47, 2 }
  0x4a   :  { %v91_v51 = vadd.f32 %v90_v48, %v89_v47 }
  0x4c   :  { %v92_v52 = vrot.slane %v91_v51, 1 }
  0x4e   :  { %v93_v55 = vadd.f32 %v92_v52, %v91_v51 }
  0x50   :  { %v109_v56 = vsel %vm108_vm7, %v93_v55, %v100_v53 }
  0x51   :  { %v111_v57 = vsel %vm110_vm8, %v109_v56, %v107_v54 }
  0x52   :  { %112 = vst [vmem:[%s291_s3] sm:$0x7] %v111_v57 }
  0x53   :  { %231 = dma.done.wait [#allocation4], 64  }
  0x54   :  { %232 = vsyncadd [#allocation4], 4294967232 }
  0x55   :  { %132 = vsyncpa [#allocation3], 1 }
  0x56   :  { %133 = vsyncpa [#allocation6], 1 }
  0x57   :  { %134 = vsyncpa [#allocation4], 1 }

</bundles_post_ra>
